<compile_context>
chip_gen: v5e
topology: v5e:2x2
jax: 0.10.0
libtpu: 0.0.40
codegen_flags: <defaults>
</compile_context>

<pallas_src>
import functools

import jax
import jax.numpy as jnp
from jax.experimental import pallas as pl
from jax.experimental.pallas import tpu as pltpu


def _vae_forward_kernel(x_ref, noise_ref,
                        w1_ref, b1_ref,
                        w23_ref, b23_ref,
                        w4_ref, b4_ref,
                        w5_ref, b5_ref,
                        musig_ref, xr_ref,
                        *, latent):
    x = x_ref[...]

    # encode: h = relu(x @ W1 + b1)
    h = jnp.dot(x, w1_ref[...], preferred_element_type=jnp.float32) + b1_ref[...]
    h = jnp.maximum(h, 0.0)

    # fused mu||sigma head: single lane-full (hidden, 2*latent) matmul,
    # stored as one lane-dense packed output.
    musig = jnp.dot(h, w23_ref[...], preferred_element_type=jnp.float32) + b23_ref[...]
    musig_ref[...] = musig

    # reparameterize in-kernel (64-lane slices of the packed tile -- cheap
    # lane-select work, fully hidden under the HBM bottleneck):
    #   z = mu + sigma * noise
    mu = musig[:, :latent]
    sigma = musig[:, latent:]
    z = mu + sigma * noise_ref[...]

    # decode: xr = sigmoid(relu(z @ W4 + b4) @ W5 + b5)
    h2 = jnp.dot(z, w4_ref[...], preferred_element_type=jnp.float32) + b4_ref[...]
    h2 = jnp.maximum(h2, 0.0)
    logits = jnp.dot(h2, w5_ref[...], preferred_element_type=jnp.float32) + b5_ref[...]
    xr_ref[...] = jax.nn.sigmoid(logits)


def _round_up(n, m):
    return ((n + m - 1) // m) * m


def prepare_vae_params(p):
    """One-time packing of the mu/sigma head (hoisted out of the per-call path)."""
    return {
        "w1": p["w1"], "b1": p["b1"],
        "w23": jnp.concatenate([p["w2"], p["w3"]], axis=1),   # (hidden, 2*latent)
        "b23": jnp.concatenate([p["b2"], p["b3"]], axis=1),   # (1, 2*latent)
        "w4": p["w4"], "b4": p["b4"],
        "w5": p["w5"], "b5": p["b5"],
    }


def vae_forward(x, noise, prep, *, block_batch=None):
    """x: (B, input_dim) f32, noise: (B, latent) f32, prep = prepare_vae_params(...).
    Returns (mu, sigma, x_reconst) matching the PyTorch module."""
    B, input_dim = x.shape
    hidden_dim = prep["w1"].shape[1]
    latent = prep["w4"].shape[0]
    two_lat = 2 * latent
    assert prep["w23"].shape == (hidden_dim, two_lat)
    # Note: for best store throughput input_dim should be a multiple of 128
    # (lane-dense xr stores); non-multiples are still correct (full-dim block).

    # ---- batch tiling: large tiles (HBM-bound), but keep >=2 grid steps so
    # the "parallel" grid axis can shard across v7x's 2 TensorCores. ---------
    b8 = _round_up(B, 8)
    if block_batch is None:
        half = _round_up(pl.cdiv(b8, 2), 8) if b8 > 8 else b8
        block_batch = min(1024, half)
    tb = max(8, _round_up(min(block_batch, b8), 8))   # f32 sublane multiple
    grid = (pl.cdiv(B, tb),)                          # ragged tail: masked block, no pad copy

    def batch_spec(cols):
        return pl.BlockSpec((tb, cols), lambda i: (i, 0))

    def const_spec(arr):
        return pl.BlockSpec(arr.shape, lambda i: (0, 0))  # VMEM-resident across grid

    # ---- advisory cost estimate -------------------------------------------
    flops = 2 * B * (input_dim * hidden_dim + hidden_dim * two_lat
                     + latent * hidden_dim + hidden_dim * input_dim)
    bytes_accessed = 4 * (
        prep["w1"].size + prep["w23"].size + prep["w4"].size + prep["w5"].size
        + prep["b1"].size + prep["b23"].size + prep["b4"].size + prep["b5"].size
        + B * (input_dim + latent)            # streamed inputs
        + B * (two_lat + input_dim))          # streamed outputs
    cost = pl.CostEstimate(flops=flops,
                           transcendentals=B * input_dim,    # sigmoid
                           bytes_accessed=bytes_accessed)

    kernel = functools.partial(_vae_forward_kernel, latent=latent)

    musig, xr = pl.pallas_call(
        kernel,
        out_shape=(jax.ShapeDtypeStruct((B, two_lat), jnp.float32),
                   jax.ShapeDtypeStruct((B, input_dim), jnp.float32)),
        grid=grid,
        in_specs=[batch_spec(input_dim),          # x
                  batch_spec(latent),             # noise
                  const_spec(prep["w1"]), const_spec(prep["b1"]),
                  const_spec(prep["w23"]), const_spec(prep["b23"]),
                  const_spec(prep["w4"]), const_spec(prep["b4"]),
                  const_spec(prep["w5"]), const_spec(prep["b5"])],
        out_specs=(pl.BlockSpec((tb, two_lat), lambda i: (i, 0)),
                   pl.BlockSpec((tb, input_dim), lambda i: (i, 0))),
        compiler_params=pltpu.CompilerParams(
            dimension_semantics=("parallel",)),
        cost_estimate=cost,
    )(x, noise,
      prep["w1"], prep["b1"],
      prep["w23"], prep["b23"],
      prep["w4"], prep["b4"],
      prep["w5"], prep["b5"])

    mu = musig[:, :latent]
    sigma = musig[:, latent:]
    return mu, sigma, xr


def _kaiming_uniform(key, fan_in, fan_out):
    # Matches nn.init.kaiming_uniform_ defaults (fan_in mode, gain=sqrt(2)):
    # bound = sqrt(6 / fan_in).  Stored as (in, out) = PyTorch weight.T layout.
    bound = jnp.sqrt(6.0 / fan_in)
    return jax.random.uniform(key, (fan_in, fan_out), jnp.float32, -bound, bound)


def init_vae_params(key, input_dim, hidden_dim=128, output_dim=64):
    k1, k2, k3, k4, k5 = jax.random.split(key, 5)
    return {
        "w1": _kaiming_uniform(k1, input_dim, hidden_dim),   # input2hidden
        "b1": jnp.zeros((1, hidden_dim), jnp.float32),
        "w2": _kaiming_uniform(k2, hidden_dim, output_dim),  # hidden2avg
        "b2": jnp.zeros((1, output_dim), jnp.float32),
        "w3": _kaiming_uniform(k3, hidden_dim, output_dim),  # hidden2std
        "b3": jnp.zeros((1, output_dim), jnp.float32),
        "w4": _kaiming_uniform(k4, output_dim, hidden_dim),  # latent2hidden
        "b4": jnp.zeros((1, hidden_dim), jnp.float32),
        "w5": _kaiming_uniform(k5, hidden_dim, input_dim),   # hidden2input
        "b5": jnp.zeros((1, input_dim), jnp.float32),
    }


def vae_forward_ref(x, noise, p):
    """Pure-JAX reference of the PyTorch forward."""
    h = jax.nn.relu(x @ p["w1"] + p["b1"])
    mu = h @ p["w2"] + p["b2"]
    sigma = h @ p["w3"] + p["b3"]
    z = mu + sigma * noise
    h2 = jax.nn.relu(z @ p["w4"] + p["b4"])
    xr = jax.nn.sigmoid(h2 @ p["w5"] + p["b5"])
    return mu, sigma, xr


if __name__ == "__main__":
    INPUT_DIM = 256
    HIDDEN_DIM = 128
    OUTPUT_DIM = 64
    BATCH = 40          # non-multiple of the tile -> exercises masked-tail block + 2-step grid

    root = jax.random.PRNGKey(0)
    k_params, k_x, k_noise = jax.random.split(root, 3)

    params = init_vae_params(k_params, INPUT_DIM, HIDDEN_DIM, OUTPUT_DIM)
    prep = prepare_vae_params(params)   # one-time packing, hoisted out of the call path

    x = jax.random.normal(k_x, (BATCH, INPUT_DIM), jnp.float32)
    noise = jax.random.normal(k_noise, (BATCH, OUTPUT_DIM), jnp.float32)

    mu, sigma, x_reconst = vae_forward(x, noise, prep)
    jax.block_until_ready((mu, sigma, x_reconst))

    # correctness check vs pure-JAX reference
    mu_r, sigma_r, xr_r = vae_forward_ref(x, noise, params)
    assert mu.shape == (BATCH, OUTPUT_DIM)
    assert sigma.shape == (BATCH, OUTPUT_DIM)
    assert x_reconst.shape == (BATCH, INPUT_DIM)
    assert jnp.allclose(mu, mu_r, atol=1e-5, rtol=1e-4)
    assert jnp.allclose(sigma, sigma_r, atol=1e-5, rtol=1e-4)
    assert jnp.allclose(x_reconst, xr_r, atol=1e-5, rtol=1e-4)

    print("KERNEL_OK")
</pallas_src>

<mosaic_0001>
module attributes {stable_mosaic.version = 11 : i64} {
  func.func @_vae_forward_kernel(%arg0: i32, %arg1: memref<24x256xf32, #tpu.memory_space<vmem>>, %arg2: memref<24x64xf32, #tpu.memory_space<vmem>>, %arg3: memref<256x128xf32, #tpu.memory_space<vmem>>, %arg4: memref<1x128xf32, #tpu.memory_space<vmem>>, %arg5: memref<128x128xf32, #tpu.memory_space<vmem>>, %arg6: memref<1x128xf32, #tpu.memory_space<vmem>>, %arg7: memref<64x128xf32, #tpu.memory_space<vmem>>, %arg8: memref<1x128xf32, #tpu.memory_space<vmem>>, %arg9: memref<128x256xf32, #tpu.memory_space<vmem>>, %arg10: memref<1x256xf32, #tpu.memory_space<vmem>>, %arg11: memref<24x128xf32, #tpu.memory_space<vmem>>, %arg12: memref<24x256xf32, #tpu.memory_space<vmem>>) attributes {dimension_semantics = [#tpu.dimension_semantics<parallel>], iteration_bounds = array<i64: 2>, scalar_prefetch = 0 : i64, scratch_operands = 0 : i64, tpu.core_type = #tpu.core_type<tc>, window_params = [{transform_indices = @transform_0, window_bounds = array<i64: 24, 256>}, {transform_indices = @transform_1, window_bounds = array<i64: 24, 64>}, {pipeline_mode = #tpu.pipeline_mode<synchronous>, transform_indices = @transform_2, window_bounds = array<i64: 256, 128>}, {pipeline_mode = #tpu.pipeline_mode<synchronous>, transform_indices = @transform_3, window_bounds = array<i64: 1, 128>}, {pipeline_mode = #tpu.pipeline_mode<synchronous>, transform_indices = @transform_4, window_bounds = array<i64: 128, 128>}, {pipeline_mode = #tpu.pipeline_mode<synchronous>, transform_indices = @transform_5, window_bounds = array<i64: 1, 128>}, {pipeline_mode = #tpu.pipeline_mode<synchronous>, transform_indices = @transform_6, window_bounds = array<i64: 64, 128>}, {pipeline_mode = #tpu.pipeline_mode<synchronous>, transform_indices = @transform_7, window_bounds = array<i64: 1, 128>}, {pipeline_mode = #tpu.pipeline_mode<synchronous>, transform_indices = @transform_8, window_bounds = array<i64: 128, 256>}, {pipeline_mode = #tpu.pipeline_mode<synchronous>, transform_indices = @transform_9, window_bounds = array<i64: 1, 256>}, {transform_indices = @transform_10, window_bounds = array<i64: 24, 128>}, {transform_indices = @transform_11, window_bounds = array<i64: 24, 256>}]} {
    %c0 = arith.constant 0 : index
    %c0_0 = arith.constant 0 : index
    %0 = vector.load %arg1[%c0, %c0_0] : memref<24x256xf32, #tpu.memory_space<vmem>>, vector<24x256xf32>
    %c0_1 = arith.constant 0 : index
    %c0_2 = arith.constant 0 : index
    %1 = vector.load %arg3[%c0_1, %c0_2] : memref<256x128xf32, #tpu.memory_space<vmem>>, vector<256x128xf32>
    %cst = arith.constant dense<0.000000e+00> : vector<24x128xf32>
    %2 = tpu.matmul %0, %1, %cst {dimension_numbers = #tpu.dot_dimension_numbers<[1], [0], [0], [1], [0, 0, 1, 1], [], []>} : vector<24x256xf32>, vector<256x128xf32>, vector<24x128xf32> -> vector<24x128xf32>
    %c0_3 = arith.constant 0 : index
    %c0_4 = arith.constant 0 : index
    %3 = vector.load %arg4[%c0_3, %c0_4] : memref<1x128xf32, #tpu.memory_space<vmem>>, vector<1x128xf32>
    %4 = vector.broadcast %3 : vector<1x128xf32> to vector<24x128xf32>
    %5 = arith.addf %2, %4 : vector<24x128xf32>
    %cst_5 = arith.constant 0.000000e+00 : f32
    %6 = vector.broadcast %cst_5 : f32 to vector<24x128xf32>
    %7 = arith.maximumf %5, %6 : vector<24x128xf32>
    %c0_6 = arith.constant 0 : index
    %c0_7 = arith.constant 0 : index
    %8 = vector.load %arg5[%c0_6, %c0_7] : memref<128x128xf32, #tpu.memory_space<vmem>>, vector<128x128xf32>
    %cst_8 = arith.constant dense<0.000000e+00> : vector<24x128xf32>
    %9 = tpu.matmul %7, %8, %cst_8 {dimension_numbers = #tpu.dot_dimension_numbers<[1], [0], [0], [1], [0, 0, 1, 1], [], []>} : vector<24x128xf32>, vector<128x128xf32>, vector<24x128xf32> -> vector<24x128xf32>
    %c0_9 = arith.constant 0 : index
    %c0_10 = arith.constant 0 : index
    %10 = vector.load %arg6[%c0_9, %c0_10] : memref<1x128xf32, #tpu.memory_space<vmem>>, vector<1x128xf32>
    %11 = vector.broadcast %10 : vector<1x128xf32> to vector<24x128xf32>
    %12 = arith.addf %9, %11 : vector<24x128xf32>
    %c0_11 = arith.constant 0 : index
    %c0_12 = arith.constant 0 : index
    %13 = vector.load %arg11[%c0_11, %c0_12] : memref<24x128xf32, #tpu.memory_space<vmem>>, vector<24x128xf32>
    tpu.vector_store %arg11[%c0_11, %c0_12], %12 {strides = array<i32>} : memref<24x128xf32, #tpu.memory_space<vmem>>, vector<24x128xf32>,
    %14 = vector.extract_strided_slice %12 {offsets = [0, 0], sizes = [24, 64], strides = [1, 1]} : vector<24x128xf32> to vector<24x64xf32>
    %15 = vector.extract_strided_slice %12 {offsets = [0, 64], sizes = [24, 64], strides = [1, 1]} : vector<24x128xf32> to vector<24x64xf32>
    %c0_13 = arith.constant 0 : index
    %c0_14 = arith.constant 0 : index
    %16 = vector.load %arg2[%c0_13, %c0_14] : memref<24x64xf32, #tpu.memory_space<vmem>>, vector<24x64xf32>
    %17 = arith.mulf %15, %16 : vector<24x64xf32>
    %18 = arith.addf %14, %17 : vector<24x64xf32>
    %c0_15 = arith.constant 0 : index
    %c0_16 = arith.constant 0 : index
    %19 = vector.load %arg7[%c0_15, %c0_16] : memref<64x128xf32, #tpu.memory_space<vmem>>, vector<64x128xf32>
    %cst_17 = arith.constant dense<0.000000e+00> : vector<24x128xf32>
    %20 = tpu.matmul %18, %19, %cst_17 {dimension_numbers = #tpu.dot_dimension_numbers<[1], [0], [0], [1], [0, 0, 1, 1], [], []>} : vector<24x64xf32>, vector<64x128xf32>, vector<24x128xf32> -> vector<24x128xf32>
    %c0_18 = arith.constant 0 : index
    %c0_19 = arith.constant 0 : index
    %21 = vector.load %arg8[%c0_18, %c0_19] : memref<1x128xf32, #tpu.memory_space<vmem>>, vector<1x128xf32>
    %22 = vector.broadcast %21 : vector<1x128xf32> to vector<24x128xf32>
    %23 = arith.addf %20, %22 : vector<24x128xf32>
    %cst_20 = arith.constant 0.000000e+00 : f32
    %24 = vector.broadcast %cst_20 : f32 to vector<24x128xf32>
    %25 = arith.maximumf %23, %24 : vector<24x128xf32>
    %c0_21 = arith.constant 0 : index
    %c0_22 = arith.constant 0 : index
    %26 = vector.load %arg9[%c0_21, %c0_22] : memref<128x256xf32, #tpu.memory_space<vmem>>, vector<128x256xf32>
    %cst_23 = arith.constant dense<0.000000e+00> : vector<24x256xf32>
    %27 = tpu.matmul %25, %26, %cst_23 {dimension_numbers = #tpu.dot_dimension_numbers<[1], [0], [0], [1], [0, 0, 1, 1], [], []>} : vector<24x128xf32>, vector<128x256xf32>, vector<24x256xf32> -> vector<24x256xf32>
    %c0_24 = arith.constant 0 : index
    %c0_25 = arith.constant 0 : index
    %28 = vector.load %arg10[%c0_24, %c0_25] : memref<1x256xf32, #tpu.memory_space<vmem>>, vector<1x256xf32>
    %29 = vector.broadcast %28 : vector<1x256xf32> to vector<24x256xf32>
    %30 = arith.addf %27, %29 : vector<24x256xf32>
    %31 = arith.negf %30 : vector<24x256xf32>
    %32 = math.exp %31 : vector<24x256xf32>
    %cst_26 = arith.constant 1.000000e+00 : f32
    %33 = vector.broadcast %cst_26 : f32 to vector<24x256xf32>
    %34 = arith.addf %33, %32 : vector<24x256xf32>
    %35 = arith.divf %33, %34 : vector<24x256xf32>
    %c0_27 = arith.constant 0 : index
    %c0_28 = arith.constant 0 : index
    %36 = vector.load %arg12[%c0_27, %c0_28] : memref<24x256xf32, #tpu.memory_space<vmem>>, vector<24x256xf32>
    tpu.vector_store %arg12[%c0_27, %c0_28], %35 {strides = array<i32>} : memref<24x256xf32, #tpu.memory_space<vmem>>, vector<24x256xf32>,
    return
  }
  func.func @transform_0(%arg0: i32) -> (i32, i32) {
    %c0_i32 = arith.constant 0 : i32
    %c0_i32_0 = arith.constant 0 : i32
    return %arg0, %c0_i32 : i32, i32
  }
  func.func @transform_1(%arg0: i32) -> (i32, i32) {
    %c0_i32 = arith.constant 0 : i32
    %c0_i32_0 = arith.constant 0 : i32
    return %arg0, %c0_i32 : i32, i32
  }
  func.func @transform_2(%arg0: i32) -> (i32, i32) {
    %c0_i32 = arith.constant 0 : i32
    %c0_i32_0 = arith.constant 0 : i32
    %c0_i32_1 = arith.constant 0 : i32
    return %c0_i32, %c0_i32_0 : i32, i32
  }
  func.func @transform_3(%arg0: i32) -> (i32, i32) {
    %c0_i32 = arith.constant 0 : i32
    %c0_i32_0 = arith.constant 0 : i32
    %c0_i32_1 = arith.constant 0 : i32
    return %c0_i32, %c0_i32_0 : i32, i32
  }
  func.func @transform_4(%arg0: i32) -> (i32, i32) {
    %c0_i32 = arith.constant 0 : i32
    %c0_i32_0 = arith.constant 0 : i32
    %c0_i32_1 = arith.constant 0 : i32
    return %c0_i32, %c0_i32_0 : i32, i32
  }
  func.func @transform_5(%arg0: i32) -> (i32, i32) {
    %c0_i32 = arith.constant 0 : i32
    %c0_i32_0 = arith.constant 0 : i32
    %c0_i32_1 = arith.constant 0 : i32
    return %c0_i32, %c0_i32_0 : i32, i32
  }
  func.func @transform_6(%arg0: i32) -> (i32, i32) {
    %c0_i32 = arith.constant 0 : i32
    %c0_i32_0 = arith.constant 0 : i32
    %c0_i32_1 = arith.constant 0 : i32
    return %c0_i32, %c0_i32_0 : i32, i32
  }
  func.func @transform_7(%arg0: i32) -> (i32, i32) {
    %c0_i32 = arith.constant 0 : i32
    %c0_i32_0 = arith.constant 0 : i32
    %c0_i32_1 = arith.constant 0 : i32
    return %c0_i32, %c0_i32_0 : i32, i32
  }
  func.func @transform_8(%arg0: i32) -> (i32, i32) {
    %c0_i32 = arith.constant 0 : i32
    %c0_i32_0 = arith.constant 0 : i32
    %c0_i32_1 = arith.constant 0 : i32
    return %c0_i32, %c0_i32_0 : i32, i32
  }
  func.func @transform_9(%arg0: i32) -> (i32, i32) {
    %c0_i32 = arith.constant 0 : i32
    %c0_i32_0 = arith.constant 0 : i32
    %c0_i32_1 = arith.constant 0 : i32
    return %c0_i32, %c0_i32_0 : i32, i32
  }
  func.func @transform_10(%arg0: i32) -> (i32, i32) {
    %c0_i32 = arith.constant 0 : i32
    %c0_i32_0 = arith.constant 0 : i32
    return %arg0, %c0_i32 : i32, i32
  }
  func.func @transform_11(%arg0: i32) -> (i32, i32) {
    %c0_i32 = arith.constant 0 : i32
    %c0_i32_0 = arith.constant 0 : i32
    return %arg0, %c0_i32 : i32, i32
  }
}

</mosaic_0001>

<bundles_post_ra>
// kernel: tpu_custom_call.1
= control target key start
LH: loop header
LB: loop body
LE: loop exit
PB: predicated region body
PF: predicated region fallthrough
CT: control target
= control target key end

     0   :  { %s2264_s0 = inlined_call_operand.hbm [shape: f32[40,256], index: 0, kind: input, shape index: {}]   ;;  %s2265_s1 = inlined_call_operand.hbm [shape: f32[40,64], index: 1, kind: input, shape index: {}]   ;;  %s2266_s2 = inlined_call_operand.hbm [shape: f32[256,128], index: 2, kind: input, shape index: {}]   ;;  %s2267_s3 = inlined_call_operand.vmem [shape: f32[1,128], index: 3, kind: input, shape index: {}]   ;;  %s2268_s4 = inlined_call_operand.hbm [shape: f32[128,128], index: 4, kind: input, shape index: {}]   ;;  %s2269_s5 = inlined_call_operand.vmem [shape: f32[1,128], index: 5, kind: input, shape index: {}]   ;;  %s2270_s6 = inlined_call_operand.hbm [shape: f32[64,128], index: 6, kind: input, shape index: {}]   ;;  %s2271_s7 = inlined_call_operand.vmem [shape: f32[1,128], index: 7, kind: input, shape index: {}]   ;;  %s2272_s8 = inlined_call_operand.hbm [shape: f32[128,256], index: 8, kind: input, shape index: {}]   ;;  %s2273_s9 = inlined_call_operand.vmem [shape: f32[1,256], index: 9, kind: input, shape index: {}]   ;;  %s2274_s10 = inlined_call_operand.hbm [shape: f32[40,128], index: 10, kind: output, shape index: {0}]   ;;  %s2275_s11 = inlined_call_operand.hbm [shape: f32[40,256], index: 11, kind: output, shape index: {1}]  }
   0x1   :  { %2286 = sst [smem:[#allocation28_spill]] %s2266_s2 }
   0x2   :  { %2287 = sst [smem:[#allocation29_spill]] %s2268_s4 }
   0x3   :  { %2288 = sst [smem:[#allocation30_spill]] %s2274_s10 }
   0x4   :  { %2289 = sst [smem:[#allocation31_spill]] %s2275_s11 }
   0x5   :  { %17 = vsyncpa [#allocation3], 0 }
   0x6   :  { %19 = vsyncpa [#allocation3 + $0x1], 0 }
   0x7   :  { %20 = vsyncpa [#allocation6], 0 }
   0x8   :  { %22 = vsyncpa [#allocation6 + $0x1], 0 }
   0x9   :  { %23 = vsyncpa [#allocation9], 0 }
   0xa   :  { %24 = vsyncpa [#allocation12], 0 }
   0xb   :  { %25 = vsyncpa [#allocation4], 0 }
   0xc   :  { %27 = vsyncpa [#allocation4 + $0x1], 0 }
   0xd   :  { %28 = vsyncpa [#allocation15], 0 }
   0xe   :  { %30 = vsyncpa [#allocation15 + $0x1], 0  ;;  %s1860_s17 = smov 0   ;;  %s1862_s18 = smov 0  }
   0xf   :  { %s1864_s19 = smov 0   ;;  %s1866_s20 = smov 0  }
  0x10 LB: > { %2290 = sst [smem:[#allocation23_spill]] %s1765_s17  ;;  %s1881_s21 = sadd.s32 4294967295, %s1777_s20   ;;  %s1777_s20 = sphi %s1866_s20, %s2326_s20   ;;  %s1773_s19 = sphi %s1864_s19, %s2330_s19   ;;  %s1769_s18 = sphi %s1862_s18, %s2329_s18   ;;  %s1765_s17 = sphi %s1860_s17, %s2328_s17  }
  0x11   : > { %s1225_s22 = sadd.s32 4294967294, %s1777_s20   ;;  %s1885_s23 = sadd.s32 1, %s1777_s20  }
  0x12   : > { %2291 = sst [smem:[#allocation24_spill]] %s1885_s23  ;;  %s43_s24 = sadd.s32 1, %s1773_s19 }
  0x13   : > { %s40_s25 = ssub.s32 %s1777_s20, %s1885_s23  ;;  %p50_p0 = scmp.ne.s32.totalorder %s1773_s19, %s1769_s18 }
  0x14   : > { %p41_p1 = scmp.eq.s32.totalorder %s40_s25, 0  ;;  %p51_p2 = scmp.eq.s32.totalorder %s1777_s20, 0 }
  0x15   : > { %p56_p3 = scmp.ne.s32.totalorder %s1769_s18, %s1765_s17  ;;  %p2284_p4 = scmp.eq.s32.totalorder %s1881_s21, 0 }
  0x16   : > { %s1897_s26 = scalar_select %p41_p1, %s1773_s19, %s43_s24  }
  0x17   : > { %p1899_p5 = por %p51_p2, %p50_p0  ;;  %p1905_p6 = por %p2284_p4, %p56_p3 }
  0x18   : > { %2292 = sst [smem:[#allocation25_spill]] %s1897_s26  ;;  %p274_p7 = scmp.eq.s32.totalorder %s1881_s21, 1 }
  0x19   : > { %p280_p8 = scmp.eq.s32.totalorder %s1225_s22, 1  ;;  %p1226_p9 = scmp.ge.s32.totalorder %s1777_s20, 1 }
  0x1a   : > { %p313_p10 = scmp.lt.s32.totalorder %s1777_s20, 3  ;;  %p1912_p11 = por %p274_p7, %p50_p0 }
  0x1b   : > { %p1916_p12 = por %p280_p8, %p56_p3  ;;  %s2300_s4 = sld [smem:[#allocation29_spill]] }
  0x1c   : > { %s2295_s29 = scalar_select %p1912_p11, 1, 0 }
  0x1d   : > { %s2297_s30 = scalar_select %p1916_p12, 1, 0 }
  0x1e   : > { %2296 = sst [smem:[#allocation26_spill]] %s2295_s29  ;;  %p1920_p13 = pnand %p1226_p9, %p313_p10 }
  0x1f   : > { %2298 = sst [smem:[#allocation27_spill]] %s2297_s30  ;;  %s1779_s22 = smov [#allocation8]  }
  0x20   : > { %p1338_p1 = pneg %p1920_p13  ;;  %s343_s24 = sshll.u32 %s1779_s22, 4  ;;  %s344_s24 = int_to_ptr.vmem [resolvable:$true] %s343_s24 }
  0x21   : > { %s341_s15 = sshll.u32 %s2300_s4, 4  ;;  %s2302_s2 = sld [smem:[#allocation28_spill]]  ;;  %s342_s15 = int_to_ptr.hbm [resolvable:$true] %s341_s15 }
  0x22   : > { %p1931_p0 = pnand %p1338_p1, %p2284_p4  ;;  %s1780_s30 = smov 128  }
  0x23   : > { %s1781_s13 = smov 8   ;;  %s358_s17 = sshll.u32 %s2270_s6, 4  ;;  %s359_s17 = int_to_ptr.hbm [resolvable:$true] %s358_s17 }
  0x24   : > { %1344 = dma.hbm_to_vmem [thread:$0]  (!%p1931_p0), %s342_s15, 2048, %s344_s24, [#allocation9], %s1780_s30, %s1780_s30, %s1781_s13  }
  0x25   : > { %s1782_s11 = smov [#allocation7]   ;;  %s1783_s22 = smov [#allocation10]  }
  0x26   : > { %s326_s10 = sshll.u32 %s1782_s11, 4  ;;  %s360_s26 = sshll.u32 %s1783_s22, 4  ;;  %s327_s10 = int_to_ptr.vmem [resolvable:$true] %s326_s10  ;;  %s361_s26 = int_to_ptr.vmem [resolvable:$true] %s360_s26 }
  0x27   : > { %s324_s23 = sshll.u32 %s2302_s2, 4  ;;  %s375_s29 = sshll.u32 %s2272_s8, 4  ;;  %s325_s23 = int_to_ptr.hbm [resolvable:$true] %s324_s23  ;;  %s376_s29 = int_to_ptr.hbm [resolvable:$true] %s375_s29 }
  0x28   : > { %1341 = dma.hbm_to_vmem [thread:$0]  (!%p1931_p0), %s325_s23, 4096, %s327_s10, [#allocation6], %s1780_s30, %s1780_s30, %s1781_s13  }
  0x29   : > { %1347 = dma.hbm_to_vmem [thread:$0]  (!%p1931_p0), %s359_s17, 1024, %s361_s26, [#allocation9], %s1780_s30, %s1780_s30, %s1781_s13  }
  0x2a   : > { %s1784_s15 = smov [#allocation11]   ;;  %s1785_s24 = smov 256  }
  0x2b   : > { %s377_s4 = sshll.u32 %s1784_s15, 4  ;;  %s1786_s14 = smov 16   ;;  %s378_s4 = int_to_ptr.vmem [resolvable:$true] %s377_s4 }
  0x2c   : > { %1350 = dma.hbm_to_vmem [thread:$0]  (!%p1931_p0), %s376_s29, 4096, %s378_s4, [#allocation12], %s1785_s24, %s1785_s24, %s1786_s14  }
  0x2d   : > { %p2283_p2 = scmp.ge.s32.totalorder %s1777_s20, 2 }
  0x2f   : > { %390 = sbr.rel (%p2283_p2) target bundleno = 128 (0x80), region = 48 }
  0x34   : > { %393 = sbr.rel (!%p1899_p5) target bundleno = 90 (0x5a), region = 52  ;;  %s394_s2 = sand.u32 (%p1899_p5), 1, %s1773_s19  }
  0x35   : > { %s399_s10 = smul.u32 (%p1899_p5), 3, %s1777_s20  ;;  %s1962_s16 = scalar_lea.sflag (%p1899_p5), [#allocation3], %s394_s2 }
  0x36   : > { %s1314_s11 = smul.u32 (%p1899_p5), 48, %s394_s2 }
  0x37   : > { %s400_s17 = ssub.s32 (%p1899_p5), 5, %s399_s10 }
  0x38   : > { %p401_p3 = scmp.lt.s32.totalorder (%p1899_p5), %s400_s17, 3  ;;  %s398_s13 = scalar_lea.vmem (%p1899_p5), [#allocation2], %s1314_s11 }
  0x3a   : > { %s2332_s17 = smov (!%p401_p3, %s400_s17), 3 }
  0x3b   : > { %s1272_s23 = sshll.u32 %s2332_s17, 4 }
  0x3c   : > { %s405_s29 = ssub.s32 48, %s1272_s23 }
  0x3d   : > { %s406_s30 = sshll.u32 %s405_s29, 4 }
  0x3e   : > { %407 = vsyncadd %s1962_s16, %s406_s30  ;;  %p1965_p7 = scmp.ne.s32.totalorder %s1272_s23, 0  ;;  %s1280_s26 = smul.u32 48, %s1777_s20 }
  0x3f   : > { %s1970_s25 = sshll.u32 %s398_s13, 4  ;;  %s1238_s15 = sshll.u32 %s2332_s17, 8  ;;  %s416_s25 = int_to_ptr.vmem [resolvable:$true] %s1970_s25 }
  0x40   : > { %s411_s14 = scalar_lea.hbm %s2264_s0, %s1280_s26  ;;  %s1565_s11 = sshrl.u32 %s1238_s15, 4 }
  0x41   : > { %s413_s2 = sshll.u32 %s411_s14, 4  ;;  %s1574_s13 = scalar_lea.hbm %s2264_s0, 80  ;;  %s1977_s2 = int_to_ptr.hbm [resolvable:$true] %s413_s2 }
  0x42   : > { %s1563_s10 = sshra.s32 %s1977_s2, 4  ;;  %s1564_s10 = int_to_ptr.hbm [resolvable:$true] %s1563_s10 }
  0x43   : > { %s1570_s23 = scalar_lea.hbm %s1564_s10, %s1565_s11  ;;  %p1575_p1 = scmp.lt.s32.totalorder %s1564_s10, %s2264_s0 }
  0x44   : > { %p1571_p8 = scmp.ne.s32.totalorder %s1564_s10, %s1570_s23  ;;  %p1576_p0 = scmp.lt.s32.totalorder %s1574_s13, %s1570_s23 }
  0x46   : > { %p1572_p9 = pnand %p1571_p8, %p1965_p7  ;;  %p1577_p3 = por %p1576_p0, %p1575_p1 }
  0x48   : > { %p1573_p10 = pneg %p1572_p9 }
  0x4a   : > { %p1578_p2 = pnand %p1577_p3, %p1573_p10 }
  0x4c   : > { %1581 = shalt.err (!%p1578_p2)
}
  0x4d   : > { %s1582_s24 = sshra.s32 %s416_s25, 4  ;;  %s1787_s29 = smov [#allocation2]   ;;  %s1583_s24 = int_to_ptr.vmem [resolvable:$true] %s1582_s24 }
  0x4e   : > { %s1589_s14 = scalar_lea.vmem %s1583_s24, %s1565_s11  ;;  %s1593_s30 = scalar_lea.vmem %s1787_s29, 96 }
  0x4f   : > { %p1590_p8 = scmp.ne.s32.totalorder %s1583_s24, %s1589_s14  ;;  %p1595_p12 = scmp.lt.s32.totalorder %s1593_s30, %s1589_s14 }
  0x51   : > { %p1591_p9 = pnand %p1590_p8, %p1965_p7 }
  0x53   : > { %p1592_p4 = pneg %p1591_p9 }
  0x55   : > { %p1597_p11 = pnand %p1595_p12, %p1592_p4 }
  0x57   : > { %1600 = shalt.err (!%p1597_p11)
}
  0x58   : > { %s1788_s10 = smov 256   ;;  %s1789_s23 = smov 16  }
  0x59   : > { %421 = dma.hbm_to_vmem [thread:$0]  (%p1965_p7), %s1977_s2, %s1238_s15, %s416_s25, %s1962_s16, %s1788_s10, %s1788_s10, %s1789_s23  }
  0x5a PF: > { %424 = sbr.rel (!%p1899_p5) target bundleno = 128 (0x80), region = 56  ;;  %s425_s11 = sand.u32 (%p1899_p5), 1, %s1777_s20  }
  0x5b   : > { %s427_s13 = sand.u32 (%p1899_p5), 1, %s1773_s19   ;;  %s430_s26 = smul.u32 (%p1899_p5), 3, %s1777_s20 }
  0x5c   : > { %s1315_s4 = smul.u32 (%p1899_p5), 24, %s427_s13  ;;  %s2010_s16 = scalar_lea.sflag (%p1899_p5), [#allocation6], %s425_s11 }
  0x5d   : > { %s431_s24 = ssub.s32 (%p1899_p5), 5, %s430_s26 }
  0x5e   : > { %p432_p4 = scmp.lt.s32.totalorder (%p1899_p5), %s431_s24, 3  ;;  %s429_s27 = scalar_lea.vmem (%p1899_p5), [#allocation5], %s1315_s4 }
  0x60   : > { %s2334_s24 = smov (!%p432_p4, %s431_s24), 3 }
  0x61   : > { %s1239_s22 = sshll.u32 %s2334_s24, 3 }
  0x62   : > { %s435_s14 = ssub.s32 24, %s1239_s22 }
  0x63   : > { %s436_s17 = sshll.u32 %s435_s14, 4 }
  0x64   : > { %437 = vsyncadd %s2010_s16, %s436_s17  ;;  %p2013_p5 = scmp.ne.s32.totalorder %s1239_s22, 0  ;;  %s1275_s15 = smul.u32 24, %s1777_s20 }
  0x65   : > { %s2018_s2 = sshll.u32 %s429_s27, 4  ;;  %s1243_s29 = sshll.u32 %s2334_s24, 7  ;;  %s445_s2 = int_to_ptr.vmem [resolvable:$true] %s2018_s2 }
  0x66   : > { %s440_s23 = scalar_lea.hbm %s2265_s1, %s1275_s15  ;;  %s1604_s4 = sshrl.u32 %s1243_s29, 4 }
  0x67   : > { %s442_s11 = sshll.u32 %s440_s23, 4  ;;  %s1613_s17 = scalar_lea.hbm %s2265_s1, 40  ;;  %s2025_s11 = int_to_ptr.hbm [resolvable:$true] %s442_s11 }
  0x68   : > { %s1602_s13 = sshra.s32 %s2025_s11, 4  ;;  %s1603_s13 = int_to_ptr.hbm [resolvable:$true] %s1602_s13 }
  0x69   : > { %s1609_s26 = scalar_lea.hbm %s1603_s13, %s1604_s4  ;;  %p1614_p7 = scmp.lt.s32.totalorder %s1603_s13, %s2265_s1 }
  0x6a   : > { %p1610_p11 = scmp.ne.s32.totalorder %s1603_s13, %s1609_s26  ;;  %p1615_p10 = scmp.lt.s32.totalorder %s1613_s17, %s1609_s26 }
  0x6c   : > { %p1611_p12 = pnand %p1610_p11, %p2013_p5  ;;  %p1616_p1 = por %p1615_p10, %p1614_p7 }
  0x6e   : > { %p1612_p2 = pneg %p1611_p12 }
  0x70   : > { %p1617_p0 = pnand %p1616_p1, %p1612_p2 }
  0x72   : > { %1620 = shalt.err (!%p1617_p0)
}
  0x73   : > { %s1621_s30 = sshra.s32 %s445_s2, 4  ;;  %s1790_s23 = smov [#allocation5]   ;;  %s1622_s30 = int_to_ptr.vmem [resolvable:$true] %s1621_s30 }
  0x74   : > { %s1628_s10 = scalar_lea.vmem %s1622_s30, %s1604_s4  ;;  %s1632_s22 = scalar_lea.vmem %s1790_s23, 48 }
  0x75   : > { %p1629_p3 = scmp.ne.s32.totalorder %s1622_s30, %s1628_s10  ;;  %p1634_p4 = scmp.lt.s32.totalorder %s1632_s22, %s1628_s10 }
  0x77   : > { %p1630_p8 = pnand %p1629_p3, %p2013_p5 }
  0x79   : > { %p1631_p9 = pneg %p1630_p8 }
  0x7b   : > { %p1636_p11 = pnand %p1634_p4, %p1631_p9 }
  0x7d   : > { %1639 = shalt.err (!%p1636_p11)
}
  0x7e   : > { %s1791_s13 = smov 128   ;;  %s1792_s26 = smov 8  }
  0x7f   : > { %450 = dma.hbm_to_vmem [thread:$0]  (%p2013_p5), %s2025_s11, %s1243_s29, %s445_s2, %s2010_s16, %s1791_s13, %s1791_s13, %s1792_s26  }
  0x80 PF: > { %456 = sbr.rel (%p1920_p13) target bundleno = 960 (0x3c0), region = 60  ;;  %s2053_s4 = sand.u32 (!%p1920_p13), 1, %s1769_s18  }
  0x81   : > { %s1316_s14 = smul.u32 (!%p1920_p13), 48, %s2053_s4  ;;  %s459_s17 = scalar_lea.sflag (!%p1920_p13), [#allocation3], %s2053_s4 }
  0x83   : > { %s2059_s27 = scalar_lea.vmem (!%p1920_p13), [#allocation2], %s1316_s14 }
  0x85   : > { %1736 = dma.done.wait (%p1905_p6), %s459_s17, 768  }
  0x86   : > { %1738 = vsyncadd (%p1905_p6), %s459_s17, 4294966528  ;;  %s468_s12 = sand.u32 1, %s1881_s21   ;;  %s1317_s24 = smul.u32 24, %s2053_s4 }
  0x87   : > { %s469_s16 = scalar_lea.sflag [#allocation6], %s468_s12 }
  0x88   : > { %s2069_s25 = scalar_lea.vmem [#allocation5], %s1317_s24 }
  0x89   : > { %1740 = dma.done.wait (%p1905_p6), %s469_s16, 384  }
  0x8a   : > { %1742 = vsyncadd (%p1905_p6), %s469_s16, 4294966912  ;;  %p2305_p13 = scmp.eq.s32.totalorder %s1881_s21, 0 }
  0x8c   : > { %1744 = dma.done.wait (%p2305_p13), [#allocation6], 4096   ;;  %p2306_p5 = pmov %p2305_p13 }
  0x8e   : > { %1746 = vsyncadd (%p2306_p5), [#allocation6], 4294963200  ;;  %p2307_p12 = pmov %p2306_p5 }
  0x8f   : > { %p2308_p2 = pmov %p2306_p5 }
  0x90   : > { %1748 = dma.done.wait (%p2307_p12), [#allocation9], 3072  }
  0x91   : > { %1750 = vsyncadd (%p2308_p2), [#allocation9], 4294964224  ;;  %p2309_p7 = pmov %p2308_p2 }
  0x92   : > { %p2310_p10 = pmov %p2308_p2 }
  0x93   : > { %1752 = dma.done.wait (%p2309_p7), [#allocation12], 4096  }
  0x94   : > { %1754 = vsyncadd (%p2310_p10), [#allocation12], 4294963200  ;;  %v585_v0 = vld [vmem:[#allocation7 + $0x78] sm:$0xff]  ;;  %v584_v1 = vld [vmem:[#allocation7 + $0x70] sm:$0xff]  ;;  %s1793_s28 = smov 64   ;;  %s2109_s30 = scalar_lea.vmem [#allocation13], %s1317_s24 }
  0x95   : > { %v601_v2 = vld [vmem:[#allocation7 + $0xf8] sm:$0xff]  ;;  %606 = vmatpush.msra.mxu0 %v585_v0  ;;  %v600_v3 = vld [vmem:[#allocation7 + $0xf0] sm:$0xff]  ;;  %v583_v4 = vld [vmem:[#allocation7 + $0x68] sm:$0xff]  ;;  %vm755_vm0 = vcmask 523264   ;;  %s2144_s26 = scalar_lea.vmem [#allocation14], %s1316_s14  ;;  %s1005_s14 = scalar_lea.sflag [#allocation4], %s2053_s4 }
  0x96   : > { %632 = vmatpush.msra.mxu1 %v601_v2  ;;  %v599_v5 = vld [vmem:[#allocation7 + $0xe8] sm:$0xff]  ;;  %v582_v6 = vld [vmem:[#allocation7 + $0x60] sm:$0xff]  ;;  %v581_v8 = vld [vmem:[#allocation7 + $0x58] sm:$0xff] }
  0x97   : > { %607 = vmatpush.msra.mxu0 %v584_v1  ;;  %v598_v7 = vld [vmem:[#allocation7 + $0xe0] sm:$0xff]  ;;  %v597_v9 = vld [vmem:[#allocation7 + $0xd8] sm:$0xff]  ;;  %v580_v10 = vld [vmem:[#allocation7 + $0x50] sm:$0xff] }
  0x98   : > { %633 = vmatpush.msra.mxu1 %v600_v3  ;;  %v596_v11 = vld [vmem:[#allocation7 + $0xd0] sm:$0xff]  ;;  %v579_v12 = vld [vmem:[#allocation7 + $0x48] sm:$0xff]  ;;  %v578_v14 = vld [vmem:[#allocation7 + $0x40] sm:$0xff] }
  0x99   : > { %608 = vmatpush.msra.mxu0 %v583_v4  ;;  %v595_v13 = vld [vmem:[#allocation7 + $0xc8] sm:$0xff]  ;;  %v594_v15 = vld [vmem:[#allocation7 + $0xc0] sm:$0xff]  ;;  %v577_v16 = vld [vmem:[#allocation7 + $0x38] sm:$0xff] }
  0x9a   : > { %634 = vmatpush.msra.mxu1 %v599_v5  ;;  %v593_v17 = vld [vmem:[#allocation7 + $0xb8] sm:$0xff]  ;;  %v576_v18 = vld [vmem:[#allocation7 + $0x30] sm:$0xff]  ;;  %v575_v22 = vld [vmem:[#allocation7 + $0x28] sm:$0xff] }
  0x9b   : > { %609 = vmatpush.msra.mxu0 %v582_v6  ;;  %v592_v19 = vld [vmem:[#allocation7 + $0xb0] sm:$0xff]  ;;  %v676_v20 = vld [vmem:[#allocation8 + $0x78] sm:$0xff]  ;;  %v591_v23 = vld [vmem:[#allocation7 + $0xa8] sm:$0xff] }
  0x9c   : > { %635 = vmatpush.msra.mxu1 %v598_v7  ;;  %v675_v21 = vld [vmem:[#allocation8 + $0x70] sm:$0xff]  ;;  %681 = vmatpush.msra.mxu2 %v676_v20  ;;  %v674_v24 = vld [vmem:[#allocation8 + $0x68] sm:$0xff]  ;;  %v574_v25 = vld [vmem:[#allocation7 + $0x20] sm:$0xff] }
  0x9d   : > { %610 = vmatpush.msra.mxu0 %v581_v8  ;;  %v590_v26 = vld [vmem:[#allocation7 + $0xa0] sm:$0xff]  ;;  %v573_v28 = vld [vmem:[#allocation7 + $0x18] sm:$0xff]  ;;  %v572_v31 = vld [vmem:[#allocation7 + $0x10] sm:$0xff] }
  0x9e   : > { %636 = vmatpush.msra.mxu1 %v597_v9  ;;  %682 = vmatpush.msra.mxu2 %v675_v21  ;;  %v673_v27 = vld [vmem:[#allocation8 + $0x60] sm:$0xff]  ;;  %v589_v29 = vld [vmem:[#allocation7 + $0x98] sm:$0xff]  ;;  %v588_v32 = vld [vmem:[#allocation7 + $0x90] sm:$0xff] }
  0x9f   : > { %611 = vmatpush.msra.mxu0 %v580_v10  ;;  %v672_v30 = vld [vmem:[#allocation8 + $0x58] sm:$0xff]  ;;  %v671_v33 = vld [vmem:[#allocation8 + $0x50] sm:$0xff]  ;;  %v571_v34 = vld [vmem:[#allocation7 + $0x8] sm:$0xff] }
  0xa0   : > { %637 = vmatpush.msra.mxu1 %v596_v11  ;;  %683 = vmatpush.msra.mxu2 %v674_v24  ;;  %v587_v35 = vld [vmem:[#allocation7 + $0x88] sm:$0xff]  ;;  %v570_v37 = vld [vmem:[#allocation7] sm:$0xff]  ;;  %v668_v42 = vld [vmem:[#allocation8 + $0x38] sm:$0xff] }
  0xa1   : > { %612 = vmatpush.msra.mxu0 %v579_v12  ;;  %v670_v36 = vld [vmem:[#allocation8 + $0x48] sm:$0xff]  ;;  %v586_v38 = vld [vmem:[#allocation7 + $0x80] sm:$0xff]  ;;  %v667_v43 = vld [vmem:[#allocation8 + $0x30] sm:$0xff] }
  0xa2   : > { %638 = vmatpush.msra.mxu1 %v595_v13  ;;  %684 = vmatpush.msra.mxu2 %v673_v27  ;;  %v564_v39 = vld [vmem:[%s2059_s27] sm:$0xff]  ;;  %v565_v40 = vld [vmem:[%s2059_s27 + $0x8] sm:$0xff]  ;;  %v566_v45 = vld [vmem:[%s2059_s27 + $0x10] sm:$0xff] }
  0xa3   : > { %613 = vmatpush.msra.mxu0 %v578_v14  ;;  %v669_v41 = vld [vmem:[#allocation8 + $0x40] sm:$0xff]  ;;  %v666_v44 = vld [vmem:[#allocation8 + $0x28] sm:$0xff]  ;;  %v664_v50 = vld [vmem:[#allocation8 + $0x18] sm:$0xff] }
  0xa4   : > { %639 = vmatpush.msra.mxu1 %v594_v15  ;;  %685 = vmatpush.msra.mxu2 %v672_v30  ;;  %v567_v46 = vld [vmem:[%s2059_s27 + $0x18] sm:$0xff]  ;;  %v665_v47 = vld [vmem:[#allocation8 + $0x20] sm:$0xff]  ;;  %v569_v49 = vld [vmem:[%s2059_s27 + $0x28] sm:$0xff] }
  0xa5   : > { %614 = vmatpush.msra.mxu0 %v577_v16  ;;  %v568_v48 = vld [vmem:[%s2059_s27 + $0x20] sm:$0xff]  ;;  %v662_v52 = vld [vmem:[#allocation8 + $0x8] sm:$0xff]  ;;  %v712_v55 = vld [vmem:[%s2069_s25 + $0x10] sm:$0xff]  ;;  %s2311_s27 = sld [smem:[#allocation26_spill]] }
  0xa6   : > { %640 = vmatpush.msra.mxu1 %v593_v17  ;;  %686 = vmatpush.msra.mxu2 %v671_v33  ;;  %v663_v51 = vld [vmem:[#allocation8 + $0x10] sm:$0xff]  ;;  %v661_v53 = vld [vmem:[#allocation8] sm:$0xff]  ;;  %v748_v24 = vld [vmem:[#allocation10 + $0x28] sm:$0xff] }
  0xa7   : > { %615 = vmatpush.msra.mxu0 %v576_v18  ;;  %v710_v54 = vld [vmem:[%s2069_s25] sm:$0xff]  ;;  %720 = vrot.lane.b32.xlu1 %v712_v55, %s1793_s28  ;;  %v711_v57 = vld [vmem:[%s2069_s25 + $0x8] sm:$0xff]  ;;  %v802_v55 = vld [vmem:[#allocation11 + $0x40] sm:$0xff] }
  0xa8   : > { %641 = vmatpush.msra.mxu1 %v592_v19  ;;  %687 = vmatpush.msra.mxu2 %v670_v36  ;;  %v1416_v56 = vld [vmem:[%s2267_s3] ss:$0 sm:$0xff]  ;;  %v823_v33 = vld [vmem:[#allocation11 + $0xe8] sm:$0xff]  ;;  %v818_v36 = vld [vmem:[#allocation11 + $0xc0] sm:$0xff] }
  0xa9   : > { %616 = vmatpush.msra.mxu0 %v575_v22  ;;  %716 = vrot.lane.b32.xlu0 %v710_v54, %s1793_s28  ;;  %v1417_v9 = vld [vmem:[%s2269_s5] ss:$0 sm:$0xff]  ;;  %v750_v22 = vld [vmem:[#allocation10 + $0x38] sm:$0xff] }
  0xaa   : > { %642 = vmatpush.msra.mxu1 %v591_v23  ;;  %688 = vmatpush.msra.mxu2 %v669_v41  ;;  %v749_v23 = vld [vmem:[#allocation10 + $0x30] sm:$0xff]  ;;  %v815_v41 = vld [vmem:[#allocation11 + $0xa8] sm:$0xff]  ;;  %v805_v54 = vld [vmem:[#allocation11 + $0x58] sm:$0xff] }
  0xab   : > { %617 = vmatpush.msra.mxu0 %v574_v25  ;;  %773 = vmatpush.msra.mxu3 %v750_v22  ;;  %v747_v25 = vld [vmem:[#allocation10 + $0x20] sm:$0xff]  ;;  %v745_v27 = vld [vmem:[#allocation10 + $0x10] sm:$0xff]  ;;  %p2312_p6 = scmp.ne.s32.totalorder %s2311_s27, 0 }
  0xac   : > { %643 = vmatpush.msra.mxu1 %v590_v26  ;;  %689 = vmatpush.msra.mxu2 %v668_v42  ;;  %v746_v26 = vld [vmem:[#allocation10 + $0x18] sm:$0xff]  ;;  %v824_v30 = vld [vmem:[#allocation11 + $0xf0] sm:$0xff]  ;;  %s1017_s12 = smul.u32 (%p2312_p6), 3, %s1881_s21 }
  0xad   : > { %618 = vmatpush.msra.mxu0 %v573_v28  ;;  %774 = vmatpush.msra.mxu3 %v749_v23  ;;  %v744_v28 = vld [vmem:[#allocation10 + $0x8] sm:$0xff]  ;;  %v812_v42 = vld [vmem:[#allocation11 + $0x90] sm:$0xff] }
  0xae   : > { %644 = vmatpush.msra.mxu1 %v589_v29  ;;  %690 = vmatpush.msra.mxu2 %v667_v43  ;;  %v743_v29 = vld [vmem:[#allocation10] sm:$0xff]  ;;  %v813_v43 = vld [vmem:[#allocation11 + $0x98] sm:$0xff]  ;;  %s1018_s24 = ssub.s32 (%p2312_p6), 5, %s1017_s12 }
  0xaf   : > { %619 = vmatpush.msra.mxu0 %v572_v31  ;;  %775 = vmatpush.msra.mxu3 %v748_v24  ;;  %v825_v31 = vld [vmem:[#allocation11 + $0xf8] sm:$0xff]  ;;  %p1019_p1 = scmp.lt.s32.totalorder (%p2312_p6), %s1018_s24, 3 }
  0xb0   : > { %645 = vmatpush.msra.mxu1 %v588_v32  ;;  %691 = vmatpush.msra.mxu2 %v666_v44  ;;  %v822_v32 = vld [vmem:[#allocation11 + $0xe0] sm:$0xff] }
  0xb1   : > { %620 = vmatpush.msra.mxu0 %v571_v34  ;;  %718 = vrot.lane.b32.xlu0 %v711_v57, %s1793_s28  ;;  %v820_v34 = vld [vmem:[#allocation11 + $0xd0] sm:$0xff]  ;;  %v810_v44 = vld [vmem:[#allocation11 + $0x80] sm:$0xff] }
  0xb2   : > { %646 = vmatpush.msra.mxu1 %v587_v35  ;;  %692 = vmatpush.msra.mxu2 %v665_v47  ;;  %v821_v35 = vld [vmem:[#allocation11 + $0xd8] sm:$0xff] }
  0xb3   : > { %621 = vmatpush.msra.mxu0 %v570_v37  ;;  %776 = vmatpush.msra.mxu3 %v747_v25  ;;  %v819_v37 = vld [vmem:[#allocation11 + $0xc8] sm:$0xff] }
  0xb4   : > { %647 = vmatpush.msra.mxu1 %v586_v38  ;;  %622 = vmatmul.f32.vlgmr.msra.gmra.mxu0 %v564_v39  ;;  %v816_v38 = vld [vmem:[#allocation11 + $0xb0] sm:$0xff]  ;;  %v817_v39 = vld [vmem:[#allocation11 + $0xb8] sm:$0xff] }
  0xb5   : > { %648 = vmatmul.f32.vlgmr.msra.gmra.mxu1 %v565_v40  ;;  %693 = vmatpush.msra.mxu2 %v664_v50  ;;  %v814_v40 = vld [vmem:[#allocation11 + $0xa0] sm:$0xff] }
  0xb6   : > { %777 = vmatpush.msra.mxu3 %v746_v26  ;;  %858 = vmatpush.msrb.mxu0 %v825_v31  ;;  %v806_v50 = vld [vmem:[#allocation11 + $0x60] sm:$0xff] }
  0xb7   : > { %694 = vmatpush.msra.mxu2 %v663_v51  ;;  %1282 = vmatpush.msrb.mxu1 %v825_v31  ;;  %v807_v51 = vld [vmem:[#allocation11 + $0x68] sm:$0xff] }
  0xb8   : > { %778 = vmatpush.msra.mxu3 %v745_v27  ;;  %859 = vmatpush.msrb.mxu0 %v823_v33 }
  0xb9   : > { %695 = vmatpush.msra.mxu2 %v662_v52  ;;  %1284 = vmatpush.msrb.mxu1 %v823_v33 }
  0xba   : > { %779 = vmatpush.msra.mxu3 %v744_v28  ;;  %860 = vmatpush.msrb.mxu0 %v821_v35 }
  0xbb   : > { %696 = vmatpush.msra.mxu2 %v661_v53  ;;  %1286 = vmatpush.msrb.mxu1 %v821_v35  ;;  %v804_v53 = vld [vmem:[#allocation11 + $0x50] sm:$0xff] }
  0xbc   : > { %625 = vmatmul.f32.gmra.mxu0 %v566_v45  ;;  %780 = vmatpush.msra.mxu3 %v743_v29  ;;  %v811_v45 = vld [vmem:[#allocation11 + $0x88] sm:$0xff] }
  0xbd   : > { %651 = vmatmul.f32.gmra.mxu1 %v567_v46  ;;  %1283 = vmatpush.msrb.mxu2 %v825_v31 }
  0xbe   : > { %832 = vmatpush.msrb.mxu3 %v824_v30  ;;  %861 = vmatpush.msrb.mxu0 %v819_v37 }
  0xbf   : > { %1285 = vmatpush.msrb.mxu2 %v823_v33  ;;  %1288 = vmatpush.msrb.mxu1 %v819_v37 }
  0xc0   : > { %833 = vmatpush.msrb.mxu3 %v822_v32  ;;  %862 = vmatpush.msrb.mxu0 %v817_v39 }
  0xc1   : > { %1287 = vmatpush.msrb.mxu2 %v821_v35  ;;  %1290 = vmatpush.msrb.mxu1 %v817_v39 }
  0xc2   : > { %834 = vmatpush.msrb.mxu3 %v820_v34  ;;  %863 = vmatpush.msrb.mxu0 %v815_v41 }
  0xc3   : > { %1289 = vmatpush.msrb.mxu2 %v819_v37  ;;  %1292 = vmatpush.msrb.mxu1 %v815_v41 }
  0xc4   : > { %628 = vmatmul.f32.gmra.mxu0 %v568_v48  ;;  %835 = vmatpush.msrb.mxu3 %v818_v36  ;;  %v808_v48 = vld [vmem:[#allocation11 + $0x70] sm:$0xff] }
  0xc5   : > { %654 = vmatmul.f32.gmra.mxu1 %v569_v49  ;;  %1291 = vmatpush.msrb.mxu2 %v817_v39  ;;  %v809_v49 = vld [vmem:[#allocation11 + $0x78] sm:$0xff] }
  0xc6   : > { %836 = vmatpush.msrb.mxu3 %v816_v38  ;;  %864 = vmatpush.msrb.mxu0 %v813_v43 }
  0xc7   : > { %1293 = vmatpush.msrb.mxu2 %v815_v41  ;;  %1294 = vmatpush.msrb.mxu1 %v813_v43 }
  0xc8   : > { %837 = vmatpush.msrb.mxu3 %v814_v40  ;;  %865 = vmatpush.msrb.mxu0 %v811_v45 }
  0xc9   : > { %1295 = vmatpush.msrb.mxu2 %v813_v43  ;;  %1296 = vmatpush.msrb.mxu1 %v811_v45 }
  0xca   : > { %838 = vmatpush.msrb.mxu3 %v812_v42  ;;  %866 = vmatpush.msrb.mxu0 %v809_v49 }
  0xcb   : > { %1298 = vmatpush.msrb.mxu1 %v809_v49  ;;  %1297 = vmatpush.msrb.mxu2 %v811_v45 }
  0xcc   : > { %839 = vmatpush.msrb.mxu3 %v810_v44  ;;  %867 = vmatpush.msrb.mxu0 %v807_v51 }
  0xcd   : > { %1300 = vmatpush.msrb.mxu1 %v807_v51  ;;  %1299 = vmatpush.msrb.mxu2 %v809_v49 }
  0xce   : > { %840 = vmatpush.msrb.mxu3 %v808_v48  ;;  %868 = vmatpush.msrb.mxu0 %v805_v54 }
  0xcf   : > { %1302 = vmatpush.msrb.mxu1 %v805_v54  ;;  %1301 = vmatpush.msrb.mxu2 %v807_v51 }
  0xd0   : > { %841 = vmatpush.msrb.mxu3 %v806_v50 }
  0xd1   : > { %1303 = vmatpush.msrb.mxu2 %v805_v54 }
  0xd2   : > { %842 = vmatpush.msrb.mxu3 %v804_v53 }
  0xd4   : > { %843 = vmatpush.msrb.mxu3 %v802_v55 }
 0x119   : > { %v721_v19 = vpop.permute.xlu1 %720 }
 0x11b   : > { %v717_v10 = vpop.permute.xlu0 %716 }
 0x123   : > { %v719_v15 = vpop.permute.xlu0 %718 }
 0x131   : > { %v623_v58 = vpop.f32.mrf.mxu0 }
 0x132   : > { %v649_v59 = vpop.f32.mrf.mxu1  ;;  %v624_v60 = vadd.f32 %v1416_v56, %v623_v58  ;;  %v800_v58 = vld [vmem:[#allocation11 + $0x30] sm:$0xff] }
 0x133   : > { %844 = vmatpush.msrb.mxu3 %v800_v58 }
 0x134   : > { %v650_v61 = vadd.f32 %v649_v59, %v624_v60  ;;  %v801_v59 = vld [vmem:[#allocation11 + $0x38] sm:$0xff] }
 0x136   : > { %v658_v62 = vmax.f32 %v650_v61, 0.0 }
 0x138   : > { %697 = vmatmul.f32.vlgmr.msra.gmra.mxu2 %v658_v62  ;;  %v798_v62 = vld [vmem:[#allocation11 + $0x20] sm:$0xff] }
 0x139   : > { %v626_v63 = vpop.f32.mrf.mxu0  ;;  %845 = vmatpush.msrb.mxu3 %v798_v62 }
 0x13a   : > { %v652_v0 = vpop.f32.mrf.mxu1  ;;  %v627_v1 = vadd.f32 %v1416_v56, %v626_v63  ;;  %v799_v63 = vld [vmem:[#allocation11 + $0x28] sm:$0xff] }
 0x13c   : > { %v653_v2 = vadd.f32 %v652_v0, %v627_v1  ;;  %v796_v0 = vld [vmem:[#allocation11 + $0x10] sm:$0xff]  ;;  %v797_v1 = vld [vmem:[#allocation11 + $0x18] sm:$0xff] }
 0x13d   : > { %846 = vmatpush.msrb.mxu3 %v796_v0 }
 0x13e   : > { %v659_v3 = vmax.f32 %v653_v2, 0.0  ;;  %v794_v2 = vld [vmem:[#allocation11] sm:$0xff] }
 0x13f   : > { %847 = vmatpush.msrb.mxu3 %v794_v2 }
 0x140   : > { %700 = vmatmul.f32.gmra.mxu2 %v659_v3  ;;  %v795_v3 = vld [vmem:[#allocation11 + $0x8] sm:$0xff] }
 0x141   : > { %v629_v4 = vpop.f32.mrf.mxu0 }
 0x142   : > { %v655_v5 = vpop.f32.mrf.mxu1  ;;  %v630_v6 = vadd.f32 %v1416_v56, %v629_v4  ;;  %v803_v56 = vld [vmem:[#allocation11 + $0x48] sm:$0xff]  ;;  %v1418_v4 = vld [vmem:[%s2271_s7] ss:$0 sm:$0xff] }
 0x143   : > { %869 = vmatpush.msrb.mxu0 %v803_v56  ;;  %1304 = vmatpush.msrb.mxu1 %v803_v56 }
 0x144   : > { %v656_v7 = vadd.f32 %v655_v5, %v630_v6  ;;  %1305 = vmatpush.msrb.mxu2 %v803_v56 }
 0x145   : > { %870 = vmatpush.msrb.mxu0 %v801_v59  ;;  %1306 = vmatpush.msrb.mxu1 %v801_v59 }
 0x146   : > { %v660_v8 = vmax.f32 %v656_v7, 0.0  ;;  %1307 = vmatpush.msrb.mxu2 %v801_v59 }
 0x147   : > { %871 = vmatpush.msrb.mxu0 %v799_v63  ;;  %1308 = vmatpush.msrb.mxu1 %v799_v63 }
 0x148   : > { %703 = vmatmul.f32.gmra.mxu2 %v660_v8 }
 0x149   : > { %1309 = vmatpush.msrb.mxu2 %v799_v63  ;;  %872 = vmatpush.msrb.mxu0 %v797_v1 }
 0x14a   : > { %1310 = vmatpush.msrb.mxu1 %v797_v1 }
 0x14b   : > { %1311 = vmatpush.msrb.mxu2 %v797_v1  ;;  %873 = vmatpush.msrb.mxu0 %v795_v3 }
 0x14c   : > { %1312 = vmatpush.msrb.mxu1 %v795_v3 }
 0x14d   : > { %1313 = vmatpush.msrb.mxu2 %v795_v3 }
 0x1bb   : > { %v698_v11 = vpop.f32.mrf.mxu2 }
 0x1bc   : > { %v2105_v12 = vadd.f32 %v1417_v9, %v698_v11 }
 0x1be   : > { %707 = vst [vmem:[%s2109_s30] sm:$0xff] %v2105_v12  ;;  %v725_v13 = vmul.f32 %v717_v10, %v2105_v12 }
 0x1c0   : > { %731 = vrot.lane.b32.xlu1 %v725_v13, %s1793_s28 }
 0x1c3   : > { %v701_v14 = vpop.f32.mrf.mxu2 }
 0x1c4   : > { %v2115_v16 = vadd.f32 %v1417_v9, %v701_v14  ;;  %v826_v14 = vld [vmem:[%s2273_s9] sm:$0x3] }
 0x1c6   : > { %708 = vst [vmem:[%s2109_s30 + $0x8] sm:$0xff] %v2115_v16  ;;  %v726_v17 = vmul.f32 %v719_v15, %v2115_v16  ;;  %v829_v15 = vperm.slane %v826_v14, 1 }
 0x1c8   : > { %733 = vrot.lane.b32.xlu2 %v726_v17, %s1793_s28 }
 0x1cb   : > { %v704_v18 = vpop.f32.mrf.mxu2 }
 0x1cc   : > { %v2121_v20 = vadd.f32 %v1417_v9, %v704_v18 }
 0x1ce   : > { %709 = vst [vmem:[%s2109_s30 + $0x10] sm:$0xff] %v2121_v20  ;;  %v727_v21 = vmul.f32 %v721_v19, %v2121_v20  ;;  %v828_v19 = vperm.slane %v826_v14, 0 }
 0x1d0   : > { %735 = vrot.lane.b32.xlu2 %v727_v21, %s1793_s28 }
 0x222   : > { %v734_v52 = vpop.permute.xlu2 %733 }
 0x223   : > { %v741_v57 = vadd.f32 %v734_v52, %v2115_v16 }
 0x22a   : > { %v736_v60 = vpop.permute.xlu2 %735 }
 0x22b   : > { %v742_v61 = vadd.f32 %v736_v60, %v2121_v20 }
 0x232   : > { %v732_v46 = vpop.permute.xlu1 %731 }
 0x233   : > { %v740_v47 = vadd.f32 %v732_v46, %v2105_v12 }
 0x235   : > { %1249 = vmatmul.msk.f32.vlgmr.msra.gmra.mxu3 %vm755_vm0, %v740_v47 }
 0x23d   : > { %1250 = vmatmul.msk.f32.gmra.mxu3 %vm755_vm0, %v741_v57 }
 0x245   : > { %1251 = vmatmul.msk.f32.gmra.mxu3 %vm755_vm0, %v742_v61 }
 0x2b8   : > { %v782_v5 = vpop.f32.mrf.mxu3 }
 0x2b9   : > { %v783_v6 = vadd.f32 %v1418_v4, %v782_v5 }
 0x2bb   : > { %v791_v7 = vmax.f32 %v783_v6, 0.0 }
 0x2bd   : > { %848 = vmatmul.f32.vlgmr.msrb.gmra.mxu3 %v791_v7  ;;  %874 = vmatmul.f32.vlgmr.msrb.gmra.mxu0 %v791_v7 }
 0x2c0   : > { %v785_v8 = vpop.f32.mrf.mxu3 }
 0x2c1   : > { %v786_v9 = vadd.f32 %v1418_v4, %v785_v8 }
 0x2c3   : > { %v792_v10 = vmax.f32 %v786_v9, 0.0 }
 0x2c5   : > { %851 = vmatmul.f32.gmra.mxu3 %v792_v10  ;;  %877 = vmatmul.f32.vlgmr.msrb.gmra.mxu1 %v792_v10 }
 0x2c8   : > { %v788_v11 = vpop.f32.mrf.mxu3 }
 0x2c9   : > { %v789_v12 = vadd.f32 %v1418_v4, %v788_v11 }
 0x2cb   : > { %v793_v13 = vmax.f32 %v789_v12, 0.0 }
 0x2cd   : > { %854 = vmatmul.f32.gmra.mxu3 %v793_v13  ;;  %880 = vmatmul.f32.vlgmr.msrb.gmra.mxu2 %v793_v13 }
 0x33a   : > { %v875_v16 = vpop.f32.mrf.mxu0 }
 0x33b   : > { %v876_v17 = vadd.f32 %v875_v16, %v829_v15 }
 0x33d   : > { %v1253_v18 = vmul.f32 -1.442695, %v876_v17 }
 0x33f   : > { %1419 = vpow2.f32 %v1253_v18 }
 0x340   : > { %v849_v20 = vpop.f32.mrf.mxu3 }
 0x341   : > { %v850_v21 = vadd.f32 %v849_v20, %v828_v19 }
 0x342   : > { %v878_v22 = vpop.f32.mrf.mxu1 }
 0x343   : > { %v1252_v23 = vmul.f32 -1.442695, %v850_v21  ;;  %v879_v24 = vadd.f32 %v878_v22, %v829_v15 }
 0x345   : > { %v1420_v25 = vpop.eup %1419  ;;  %1421 = vpow2.f32 %v1252_v23  ;;  %v1255_v26 = vmul.f32 -1.442695, %v879_v24 }
 0x346   : > { %v903_v27 = vadd.f32 1.0, %v1420_v25 }
 0x347   : > { %1423 = vpow2.f32 %v1255_v26 }
 0x348   : > { %1425 = vrcp.f32 %v903_v27  ;;  %v852_v28 = vpop.f32.mrf.mxu3  ;;  %v934_v40 = vand.u32 2147483648, %v903_v27  ;;  %v932_v45 = vand.u32 2147483647, %v903_v27  ;;  %vm928_vm2 = vweird.f32 %v903_v27 }
 0x349   : > { %v853_v29 = vadd.f32 %v852_v28, %v828_v19 }
 0x34a   : > { %v935_v52 = vor.u32 1.1754944e-38, %v934_v40  ;;  %vm933_vm4 = vcmp.eq.f32.partialorder %v932_v45, 8.507059e+37 }
 0x34b   : > { %v1422_v30 = vpop.eup %1421  ;;  %v1254_v31 = vmul.f32 -1.442695, %v853_v29 }
 0x34c   : > { %v902_v32 = vadd.f32 1.0, %v1422_v30 }
 0x34d   : > { %v1424_v33 = vpop.eup %1423  ;;  %1427 = vpow2.f32 %v1254_v31 }
 0x34e   : > { %v1426_v34 = vpop.eup %1425  ;;  %1429 = vrcp.f32 %v902_v32  ;;  %v905_v36 = vadd.f32 1.0, %v1424_v33  ;;  %v919_v57 = vand.u32 2147483648, %v902_v32  ;;  %v917_v60 = vand.u32 2147483647, %v902_v32 }
 0x34f   : > { %v924_v35 = vmul.f32 %v1426_v34, %v903_v27  ;;  %vm929_vm1 = vweird.f32 %v1426_v34  ;;  %vm913_vm6 = vweird.f32 %v902_v32 }
 0x350   : > { %v855_v37 = vpop.f32.mrf.mxu3  ;;  %v881_v38 = vpop.f32.mrf.mxu2  ;;  %1431 = vrcp.f32 %v905_v36  ;;  %vm930_vm3 = vmor %vm928_vm2, %vm929_vm1  ;;  %v962_v63 = vand.u32 2147483647, %v905_v36  ;;  %v964_v0 = vand.u32 2147483648, %v905_v36  ;;  %v920_v2 = vor.u32 1.1754944e-38, %v919_v57 }
 0x351   : > { %v925_v39 = vsub.f32 1.0, %v924_v35  ;;  %v856_v41 = vadd.f32 %v855_v37, %v828_v19  ;;  %v882_v42 = vadd.f32 %v881_v38, %v829_v15  ;;  %vm918_vm9 = vcmp.eq.f32.partialorder %v917_v60, 8.507059e+37 }
 0x352   : > { %vm958_vm10 = vweird.f32 %v905_v36  ;;  %vm963_vm12 = vcmp.eq.f32.partialorder %v962_v63, 8.507059e+37  ;;  %v965_v11 = vor.u32 1.1754944e-38, %v964_v0 }
 0x353   : > { %v1428_v43 = vpop.eup %1427  ;;  %v926_v44 = vmul.f32 %v1426_v34, %v925_v39  ;;  %v1256_v48 = vmul.f32 -1.442695, %v856_v41  ;;  %v1257_v51 = vmul.f32 -1.442695, %v882_v42 }
 0x354   : > { %v1430_v46 = vpop.eup %1429  ;;  %v2139_v47 = vadd.f32 1.0, %v1428_v43 }
 0x355   : > { %v927_v49 = vadd.f32 %v1426_v34, %v926_v44  ;;  %v909_v50 = vmul.f32 %v1430_v46, %v902_v32  ;;  %vm914_vm5 = vweird.f32 %v1430_v46 }
 0x356   : > { %1433 = vrcp.f32 %v2139_v47  ;;  %v1432_v53 = vpop.eup %1431  ;;  %vm915_vm7 = vmor %vm913_vm6, %vm914_vm5  ;;  %v947_v14 = vand.u32 2147483647, %v2139_v47  ;;  %v949_v15 = vand.u32 2147483648, %v2139_v47  ;;  %vm943_vm14 = vweird.f32 %v2139_v47 }
 0x357   : > { %v931_v54 = vsel %vm930_vm3, %v1426_v34, %v927_v49  ;;  %v910_v55 = vsub.f32 1.0, %v909_v50  ;;  %1435 = vpow2.f32 %v1256_v48  ;;  %v954_v58 = vmul.f32 %v1432_v53, %v905_v36 }
 0x358   : > { %v936_v56 = vsel %vm933_vm4, %v935_v52, %v931_v54  ;;  %1437 = vpow2.f32 %v1257_v51  ;;  %vm959_vm8 = vweird.f32 %v1432_v53  ;;  %v950_v20 = vor.u32 1.1754944e-38, %v949_v15 }
 0x359   : > { %999 = vst [vmem:[%s2144_s26 + $0x8] sm:$0xff] %v936_v56  ;;  %v911_v59 = vmul.f32 %v1430_v46, %v910_v55  ;;  %v955_v61 = vsub.f32 1.0, %v954_v58  ;;  %vm960_vm11 = vmor %vm958_vm10, %vm959_vm8  ;;  %vm948_vm0 = vcmp.eq.f32.partialorder %v947_v14, 8.507059e+37 }
 0x35b   : > { %v912_v62 = vadd.f32 %v1430_v46, %v911_v59  ;;  %v956_v3 = vmul.f32 %v1432_v53, %v955_v61 }
 0x35c   : > { %v1434_v1 = vpop.eup %1433 }
 0x35d   : > { %v1436_v4 = vpop.eup %1435  ;;  %v916_v5 = vsel %vm915_vm7, %v1430_v46, %v912_v62  ;;  %v939_v6 = vmul.f32 %v1434_v1, %v2139_v47  ;;  %v957_v8 = vadd.f32 %v1432_v53, %v956_v3  ;;  %vm944_vm13 = vweird.f32 %v1434_v1 }
 0x35e   : > { %v921_v7 = vsel %vm918_vm9, %v920_v2, %v916_v5  ;;  %v906_v9 = vadd.f32 1.0, %v1436_v4  ;;  %v1438_v10 = vpop.eup %1437  ;;  %vm945_vm15 = vmor %vm943_vm14, %vm944_vm13 }
 0x35f   : > { %998 = vst [vmem:[%s2144_s26] sm:$0xff] %v921_v7  ;;  %v940_v12 = vsub.f32 1.0, %v939_v6  ;;  %v961_v13 = vsel %vm960_vm11, %v1432_v53, %v957_v8  ;;  %v907_v18 = vadd.f32 1.0, %v1438_v10 }
 0x360   : > { %1439 = vrcp.f32 %v906_v9  ;;  %v966_v16 = vsel %vm963_vm12, %v965_v11, %v961_v13  ;;  %v979_v27 = vand.u32 2147483648, %v906_v9  ;;  %v977_v30 = vand.u32 2147483647, %v906_v9 }
 0x361   : > { %v941_v17 = vmul.f32 %v1434_v1, %v940_v12  ;;  %1001 = vst [vmem:[%s2144_s26 + $0x18] sm:$0xff] %v966_v16  ;;  %1441 = vrcp.f32 %v907_v18  ;;  %vm973_vm2 = vweird.f32 %v906_v9  ;;  %v994_v33 = vand.u32 2147483648, %v907_v18 }
 0x362   : > { %v980_v34 = vor.u32 1.1754944e-38, %v979_v27  ;;  %v992_v36 = vand.u32 2147483647, %v907_v18  ;;  %vm978_vm5 = vcmp.eq.f32.partialorder %v977_v30, 8.507059e+37  ;;  %vm988_vm6 = vweird.f32 %v907_v18 }
 0x363   : > { %v942_v19 = vadd.f32 %v1434_v1, %v941_v17  ;;  %v995_v40 = vor.u32 1.1754944e-38, %v994_v33 }
 0x364   : > { %vm993_vm8 = vcmp.eq.f32.partialorder %v992_v36, 8.507059e+37 }
 0x365   : > { %v946_v21 = vsel %vm945_vm15, %v1434_v1, %v942_v19 }
 0x366   : > { %v1440_v22 = vpop.eup %1439  ;;  %v951_v23 = vsel %vm948_vm0, %v950_v20, %v946_v21 }
 0x367   : > { %1000 = vst [vmem:[%s2144_s26 + $0x10] sm:$0xff] %v951_v23  ;;  %v969_v24 = vmul.f32 %v1440_v22, %v906_v9  ;;  %v1442_v25 = vpop.eup %1441  ;;  %vm974_vm1 = vweird.f32 %v1440_v22 }
 0x368   : > { %v984_v28 = vmul.f32 %v1442_v25, %v907_v18  ;;  %vm975_vm3 = vmor %vm973_vm2, %vm974_vm1  ;;  %vm989_vm4 = vweird.f32 %v1442_v25 }
 0x369   : > { %v970_v26 = vsub.f32 1.0, %v969_v24  ;;  %vm990_vm7 = vmor %vm988_vm6, %vm989_vm4 }
 0x36a   : > { %v985_v31 = vsub.f32 1.0, %v984_v28 }
 0x36b   : > { %v971_v29 = vmul.f32 %v1440_v22, %v970_v26 }
 0x36c   : > { %v986_v35 = vmul.f32 %v1442_v25, %v985_v31 }
 0x36d   : > { %v972_v32 = vadd.f32 %v1440_v22, %v971_v29 }
 0x36e   : > { %v987_v39 = vadd.f32 %v1442_v25, %v986_v35  ;;  %1016 = sbr.rel (!%p2312_p6) target bundleno = 915 (0x393), region = 88 }
 0x36f   : > { %v976_v37 = vsel %vm975_vm3, %v1440_v22, %v972_v32 }
 0x370   : > { %v981_v38 = vsel %vm978_vm5, %v980_v34, %v976_v37  ;;  %v991_v41 = vsel %vm990_vm7, %v1442_v25, %v987_v39 }
 0x371   : > { %1002 = vst [vmem:[%s2144_s26 + $0x20] sm:$0xff] %v981_v38  ;;  %v996_v42 = vsel %vm993_vm8, %v995_v40, %v991_v41 }
 0x372   : > { %1003 = vst [vmem:[%s2144_s26 + $0x28] sm:$0xff] %v996_v42 }
 0x373   : > { %s2336_s24 = smov (!%p1019_p1, %s1018_s24), 3 }
 0x374   : > { %s1258_s16 = sshll.u32 %s2336_s24, 3 }
 0x375   : > { %s1022_s25 = ssub.s32 24, %s1258_s16 }
 0x376   : > { %s1023_s28 = sshll.u32 %s1022_s25, 4 }
 0x377   : > { %1024 = vsyncadd %s1005_s14, %s1023_s28  ;;  %p2166_p0 = scmp.ne.s32.totalorder %s1258_s16, 0  ;;  %s1276_s29 = smul.u32 24, %s1881_s21 }
 0x378   : > { %s1029_s11 = sshll.u32 %s2109_s30, 4  ;;  %s2285_s15 = sshll.u32 %s2336_s24, 7  ;;  %s2176_s11 = int_to_ptr.vmem [resolvable:$true] %s1029_s11 }
 0x379   : > { %s2314_s22 = sld [smem:[#allocation30_spill]]  ;;  %s1641_s12 = sshra.s32 %s2176_s11, 4  ;;  %s1642_s12 = int_to_ptr.vmem [resolvable:$true] %s1641_s12 }
 0x37a   : > { %s1643_s16 = sshrl.u32 %s2285_s15, 4  ;;  %s1794_s30 = smov [#allocation13]  }
 0x37b   : > { %s1648_s25 = scalar_lea.vmem %s1642_s12, %s1643_s16  ;;  %s1652_s28 = scalar_lea.vmem %s1794_s30, 48 }
 0x37c   : > { %p1649_p3 = scmp.ne.s32.totalorder %s1642_s12, %s1648_s25  ;;  %p1654_p4 = scmp.lt.s32.totalorder %s1652_s28, %s1648_s25 }
 0x37e   : > { %p1650_p8 = pnand %p1649_p3, %p2166_p0 }
 0x37f   : > { %s1027_s13 = scalar_lea.hbm %s2314_s22, %s1276_s29 }
 0x380   : > { %s1031_s27 = sshll.u32 %s1027_s13, 4  ;;  %p1651_p9 = pneg %p1650_p8  ;;  %s2178_s27 = int_to_ptr.hbm [resolvable:$true] %s1031_s27 }
 0x382   : > { %p1656_p11 = pnand %p1654_p4, %p1651_p9 }
 0x384   : > { %1659 = shalt.err (!%p1656_p11)
}
 0x385   : > { %s1660_s29 = sshra.s32 %s2178_s27, 4  ;;  %s1671_s12 = scalar_lea.hbm %s2314_s22, 40  ;;  %s1661_s29 = int_to_ptr.hbm [resolvable:$true] %s1660_s29 }
 0x386   : > { %s1667_s10 = scalar_lea.hbm %s1661_s29, %s1643_s16  ;;  %p1672_p2 = scmp.lt.s32.totalorder %s1661_s29, %s2314_s22 }
 0x387   : > { %p1668_p13 = scmp.ne.s32.totalorder %s1661_s29, %s1667_s10  ;;  %p1673_p7 = scmp.lt.s32.totalorder %s1671_s12, %s1667_s10 }
 0x389   : > { %p1669_p5 = pnand %p1668_p13, %p2166_p0  ;;  %p1674_p10 = por %p1673_p7, %p1672_p2 }
 0x38b   : > { %p1670_p12 = pneg %p1669_p5 }
 0x38d   : > { %p1675_p6 = pnand %p1674_p10, %p1670_p12 }
 0x38f   : > { %1678 = shalt.err (!%p1675_p6)
}
 0x390   : > { %s1795_s25 = smov 128   ;;  %s1796_s16 = smov 8  }
 0x391   : > { %s2315_s30 = sshll.u32 %s2336_s24, 7 }
 0x392   : > { %1037 = dma.vmem_to_hbm [thread:$0]  (%p2166_p0), %s2176_s11, %s2315_s30, %s2178_s27, %s1005_s14, %s1795_s25, %s1795_s25, %s1796_s16  }
 0x393 PF: > { %s2316_s28 = sld [smem:[#allocation26_spill]] }
 0x399   : > { %p2317_p1 = scmp.ne.s32.totalorder %s2316_s28, 0 }
 0x39a   : > { %s1041_s17 = smul.u32 (%p2317_p1), 3, %s1881_s21  ;;  %s2318_s13 = scalar_lea.sflag (%p2317_p1), [#allocation15], %s2053_s4 }
 0x39b   : > { %1040 = sbr.rel (!%p2317_p1) target bundleno = 960 (0x3c0), region = 92 }
 0x39c   : > { %s1042_s15 = ssub.s32 (%p2317_p1), 5, %s1041_s17 }
 0x39d   : > { %p1043_p3 = scmp.lt.s32.totalorder (%p2317_p1), %s1042_s15, 3 }
 0x3a0   : > { %s2338_s15 = smov (!%p1043_p3, %s1042_s15), 3 }
 0x3a1   : > { %s1277_s29 = sshll.u32 %s2338_s15, 4 }
 0x3a2   : > { %s1047_s10 = ssub.s32 48, %s1277_s29 }
 0x3a3   : > { %s1048_s23 = sshll.u32 %s1047_s10, 4 }
 0x3a4   : > { %1049 = vsyncadd %s2318_s13, %s1048_s23  ;;  %p2210_p0 = scmp.ne.s32.totalorder %s1277_s29, 0  ;;  %s1281_s24 = smul.u32 48, %s1881_s21 }
 0x3a5   : > { %s1055_s2 = sshll.u32 %s2144_s26, 4  ;;  %s1269_s11 = sshll.u32 %s2338_s15, 8  ;;  %s2220_s2 = int_to_ptr.vmem [resolvable:$true] %s1055_s2 }
 0x3a6   : > { %s2320_s25 = sld [smem:[#allocation31_spill]]  ;;  %s1680_s28 = sshra.s32 %s2220_s2, 4  ;;  %s1681_s28 = int_to_ptr.vmem [resolvable:$true] %s1680_s28 }
 0x3a7   : > { %s1682_s17 = sshrl.u32 %s1269_s11, 4  ;;  %s1797_s21 = smov [#allocation14]  }
 0x3a8   : > { %s1687_s29 = scalar_lea.vmem %s1681_s28, %s1682_s17  ;;  %s1691_s26 = scalar_lea.vmem %s1797_s21, 96 }
 0x3a9   : > { %p1688_p8 = scmp.ne.s32.totalorder %s1681_s28, %s1687_s29  ;;  %p1693_p11 = scmp.lt.s32.totalorder %s1691_s26, %s1687_s29 }
 0x3ab   : > { %p1689_p9 = pnand %p1688_p8, %p2210_p0 }
 0x3ac   : > { %s1053_s16 = scalar_lea.hbm %s2320_s25, %s1281_s24 }
 0x3ad   : > { %s1057_s30 = sshll.u32 %s1053_s16, 4  ;;  %p1690_p4 = pneg %p1689_p9  ;;  %s2222_s30 = int_to_ptr.hbm [resolvable:$true] %s1057_s30 }
 0x3af   : > { %p1695_p13 = pnand %p1693_p11, %p1690_p4 }
 0x3b1   : > { %1698 = shalt.err (!%p1695_p13)
}
 0x3b2   : > { %s1699_s10 = sshra.s32 %s2222_s30, 4  ;;  %s1710_s27 = scalar_lea.hbm %s2320_s25, 80  ;;  %s1700_s10 = int_to_ptr.hbm [resolvable:$true] %s1699_s10 }
 0x3b3   : > { %s1706_s23 = scalar_lea.hbm %s1700_s10, %s1682_s17  ;;  %p1711_p7 = scmp.lt.s32.totalorder %s1700_s10, %s2320_s25 }
 0x3b4   : > { %p1707_p5 = scmp.ne.s32.totalorder %s1700_s10, %s1706_s23  ;;  %p1712_p10 = scmp.lt.s32.totalorder %s1710_s27, %s1706_s23 }
 0x3b6   : > { %p1708_p12 = pnand %p1707_p5, %p2210_p0  ;;  %p1713_p6 = por %p1712_p10, %p1711_p7 }
 0x3b8   : > { %p1709_p2 = pneg %p1708_p12 }
 0x3ba   : > { %p1714_p1 = pnand %p1713_p6, %p1709_p2 }
 0x3bc   : > { %1717 = shalt.err (!%p1714_p1)
}
 0x3bd   : > { %s1798_s28 = smov 256   ;;  %s1799_s17 = smov 16  }
 0x3be   : > { %s2321_s29 = scalar_lea.sflag [#allocation15], %s2053_s4 }
 0x3bf   : > { %1063 = dma.vmem_to_hbm [thread:$0]  (%p2210_p0), %s2220_s2, %s1269_s11, %s2222_s30, %s2321_s29, %s1798_s28, %s1798_s28, %s1799_s17  }
 0x3c0 PF: > { %s2322_s21 = sld [smem:[#allocation23_spill]]  ;;  %p2325_p8 = scmp.ge.s32.totalorder %s1777_s20, 2 }
 0x3c1   : > { %s2323_s26 = sld [smem:[#allocation27_spill]] }
 0x3c6   : > { %s1072_s10 = sand.u32 1, %s2322_s21  }
 0x3c7   : > { %p2324_p3 = scmp.ne.s32.totalorder %s2323_s26, 0  ;;  %s1073_s23 = scalar_lea.sflag [#allocation4], %s1072_s10 }
 0x3c9   : > { %p1352_p9 = pnand %p2325_p8, %p2324_p3 }
 0x3cb   : > { %p1353_p4 = pneg %p1352_p9 }
 0x3cd   : > { %1756 = dma.done.wait (%p1353_p4), %s1073_s23, 384  }
 0x3ce   : > { %1758 = vsyncadd (%p1353_p4), %s1073_s23, 4294966912  ;;  %s1083_s13 = scalar_lea.sflag [#allocation15], %s1072_s10 }
 0x3cf   : > { %1760 = dma.done.wait (%p1353_p4), %s1083_s13, 768  }
 0x3d0   : > { %1762 = vsyncadd (%p1353_p4), %s1083_s13, 4294966528  ;;  %s2326_s20 = sld [smem:[#allocation24_spill]]  ;;  %s2328_s17 = smov %s1769_s18 }
 0x3d1   : > { %s2327_s4 = sld [smem:[#allocation25_spill]]  ;;  %s2329_s18 = smov %s1773_s19 }
 0x3d6   : > { %p33_p0 = scmp.ge.s32.totalorder %s2326_s20, 4  }
 0x3d7   : > { %s2330_s19 = smov %s2327_s4 }
 0x3d8   :  { %35 = sbr.rel (!%p33_p0) target bundleno = 16 (0x10), region = 151 }
 0x3dd   :  { %1089 = vsyncpa [#allocation3], 1 }
 0x3de   :  { %1091 = vsyncpa [#allocation3 + $0x1], 1 }
 0x3df   :  { %1092 = vsyncpa [#allocation6], 1 }
 0x3e0   :  { %1094 = vsyncpa [#allocation6 + $0x1], 1 }
 0x3e1   :  { %1095 = vsyncpa [#allocation9], 1 }
 0x3e2   :  { %1096 = vsyncpa [#allocation12], 1 }
 0x3e3   :  { %1097 = vsyncpa [#allocation4], 1 }
 0x3e4   :  { %1099 = vsyncpa [#allocation4 + $0x1], 1 }
 0x3e5   :  { %1100 = vsyncpa [#allocation15], 1 }
 0x3e6   :  { %1102 = vsyncpa [#allocation15 + $0x1], 1 }

</bundles_post_ra>
